<compile_context>
chip_gen: v7x
topology: tpu7x:2x2x1
jax: 0.10.0
libtpu: 0.0.40
codegen_flags: <defaults>
</compile_context>

<pallas_src>
import functools

import jax
import jax.numpy as jnp
from jax.experimental import pallas as pl
from jax.experimental.pallas import tpu as pltpu

IN_DIM = 10    # fc1 in_features
HID_DIM = 10   # fc1 out_features / fc2 in_features
OUT_DIM = 1    # fc2 out_features
LANES = 128


def _round_up(n, m):
    return ((n + m - 1) // m) * m


def rho_kernel(xt_ref, w1t_ref, b1_ref, w2t_ref, b2_ref, out_ref):
    # xt_ref : (IN_DIM, TILE_B)   -- batch rides the 128-lane axis (lane-dense)
    # w1t_ref: (HID_DIM, IN_DIM)  b1_ref: (HID_DIM, 1)
    # w2t_ref: (OUT_DIM, HID_DIM) b2_ref: (OUT_DIM, 1)
    xt = xt_ref[...]

    # fc1 + ReLU, transposed:  h^T = relu(W1^T x^T + b1)
    h = jnp.dot(w1t_ref[...], xt,
                preferred_element_type=jnp.float32) + b1_ref[...]
    h = jnp.maximum(h, 0.0)                                     # (HID, TILE_B)

    # fc2 + ReLU, transposed:  y^T = relu(W2^T h^T + b2)
    y = jnp.dot(w2t_ref[...], h,
                preferred_element_type=jnp.float32) + b2_ref[...]
    out_ref[...] = jnp.maximum(y, 0.0).astype(out_ref.dtype)    # (OUT, TILE_B)


@functools.partial(jax.jit, static_argnames=("tile_b", "feature_major"))
def digit_sum_text_rho_1d(x, w1, b1, w2, b2, *, tile_b=4096, feature_major=False):
    """Performance entry point.

    x: (B, 10) batch-major (PyTorch layout), or (10, B) if feature_major=True
       (preferred: avoids any wrapper-side relayout of x).
    w1: (10, 10) (in, out) = torch fc1.weight.T;  b1: (10,)
    w2: (10, 1)  (in, out) = torch fc2.weight.T;  b2: (1,)
    Returns a flat (B,) float32 vector == relu(fc2(relu(fc1(x)))).squeeze(-1).
    """
    if feature_major:
        B = x.shape[1]
        xt = x.astype(jnp.float32)                   # already (IN_DIM, B)
    else:
        B = x.shape[0]
        xt = x.astype(jnp.float32).T                 # (IN_DIM, B), lane-dense

    # Tile size: multiple of 128, no larger than the (rounded-up) batch.
    tile_b = _round_up(max(tile_b, LANES), LANES)
    tile_b = min(tile_b, _round_up(B, LANES))
    n_tiles = pl.cdiv(B, tile_b)
    b_pad = n_tiles * tile_b
    if b_pad != B:
        # Pad only the ragged remainder along the lane axis (no zeros+set pass).
        xt = jnp.pad(xt, ((0, 0), (0, b_pad - B)))

    w1t = w1.astype(jnp.float32).T                   # (HID, IN)
    b1c = b1.astype(jnp.float32).reshape(HID_DIM, 1)
    w2t = w2.astype(jnp.float32).T                   # (OUT, HID)
    b2c = b2.astype(jnp.float32).reshape(OUT_DIM, 1)

    const = lambda i: (0, 0)   # params stay resident in VMEM across grid steps

    # Triple-buffer the x stream only when the grid is long enough to pipeline.
    if n_tiles > 2:
        x_spec = pl.BlockSpec((IN_DIM, tile_b), lambda i: (0, i),
                              pipeline_mode=pl.Buffered(3))
    else:
        x_spec = pl.BlockSpec((IN_DIM, tile_b), lambda i: (0, i))

    param_bytes = (IN_DIM * HID_DIM + HID_DIM + HID_DIM * OUT_DIM + OUT_DIM) * 4
    cost = pl.CostEstimate(
        flops=2 * (IN_DIM * HID_DIM + HID_DIM * OUT_DIM) * b_pad,
        transcendentals=0,
        bytes_accessed=(IN_DIM + OUT_DIM) * b_pad * 4 + param_bytes,
    )

    out_t = pl.pallas_call(
        rho_kernel,
        out_shape=jax.ShapeDtypeStruct((OUT_DIM, b_pad), jnp.float32),
        grid=(n_tiles,),
        in_specs=[
            x_spec,                                          # x tile (streamed)
            pl.BlockSpec((HID_DIM, IN_DIM), const),          # W1^T
            pl.BlockSpec((HID_DIM, 1), const),               # b1
            pl.BlockSpec((OUT_DIM, HID_DIM), const),         # W2^T
            pl.BlockSpec((OUT_DIM, 1), const),               # b2
        ],
        out_specs=pl.BlockSpec((OUT_DIM, tile_b), lambda i: (0, i)),
        compiler_params=pltpu.CompilerParams(
            dimension_semantics=("parallel",)),
        cost_estimate=cost,
    )(xt, w1t, b1c, w2t, b2c)

    # Lane-dense result; strip batch padding, keep it 1-D (no (B,1) relayout).
    return out_t[0, :B]


def digit_sum_text_rho(x, w1, b1, w2, b2, *, tile_b=4096):
    """Drop-in equivalent of the PyTorch module: x (B, 10) -> (B, 1).

    Prefer digit_sum_text_rho_1d when the caller can consume a flat (B,)
    result — the (B, 1) layout forces a lane-padded HBM relayout.
    """
    return digit_sum_text_rho_1d(x, w1, b1, w2, b2, tile_b=tile_b)[:, None]


if __name__ == "__main__":
    key = jax.random.PRNGKey(0)
    kx, k1, k2, k3, k4 = jax.random.split(key, 5)

    def init_linear(kw, kb, fan_in, fan_out):
        bound = 1.0 / (fan_in ** 0.5)     # torch default init scale
        w = jax.random.uniform(kw, (fan_in, fan_out), jnp.float32, -bound, bound)
        b = jax.random.uniform(kb, (fan_out,), jnp.float32, -bound, bound)
        return w, b

    w1, b1 = init_linear(k1, k2, IN_DIM, HID_DIM)   # fc1
    w2, b2 = init_linear(k3, k4, HID_DIM, OUT_DIM)  # fc2

    def reference(x):
        h = jnp.maximum(x @ w1 + b1, 0.0)
        return jnp.maximum(h @ w2 + b2, 0.0)

    # Case 1: module-faithful (B, 1) output; single big tile (no padding).
    B = 512
    x = jax.random.normal(kx, (B, IN_DIM), dtype=jnp.float32)
    out = jax.block_until_ready(digit_sum_text_rho(x, w1, b1, w2, b2))
    assert out.shape == (B, OUT_DIM)
    assert jnp.allclose(out, reference(x), atol=1e-4, rtol=1e-4), "case1 mismatch"

    # Case 2: ragged batch + multi-tile grid (exercises padding + Buffered(3)).
    B2 = 900
    x2 = jax.random.normal(kx, (B2, IN_DIM), dtype=jnp.float32)
    out2 = jax.block_until_ready(
        digit_sum_text_rho_1d(x2, w1, b1, w2, b2, tile_b=256))
    assert out2.shape == (B2,)
    assert jnp.allclose(out2, reference(x2)[:, 0], atol=1e-4, rtol=1e-4), "case2 mismatch"

    # Case 3: feature-major producer path — zero wrapper-side relayout of x.
    out3 = jax.block_until_ready(
        digit_sum_text_rho_1d(x.T, w1, b1, w2, b2, feature_major=True))
    assert jnp.allclose(out3, reference(x)[:, 0], atol=1e-4, rtol=1e-4), "case3 mismatch"

    print("KERNEL_OK")
</pallas_src>

<mosaic_0001>
module attributes {stable_mosaic.version = 11 : i64} {
  func.func @rho_kernel(%arg0: i32, %arg1: memref<10x512xf32, #tpu.memory_space<vmem>>, %arg2: memref<10x10xf32, #tpu.memory_space<vmem>>, %arg3: memref<10x1xf32, #tpu.memory_space<vmem>>, %arg4: memref<1x10xf32, #tpu.memory_space<vmem>>, %arg5: memref<1x1xf32, #tpu.memory_space<vmem>>, %arg6: memref<1x512xf32, #tpu.memory_space<vmem>>) attributes {dimension_semantics = [#tpu.dimension_semantics<parallel>], iteration_bounds = array<i64: 1>, scalar_prefetch = 0 : i64, scratch_operands = 0 : i64, tpu.core_type = #tpu.core_type<tc>, window_params = [{transform_indices = @transform_0, window_bounds = array<i64: 10, 512>}, {pipeline_mode = #tpu.pipeline_mode<synchronous>, transform_indices = @transform_1, window_bounds = array<i64: 10, 10>}, {pipeline_mode = #tpu.pipeline_mode<synchronous>, transform_indices = @transform_2, window_bounds = array<i64: 10, 1>}, {pipeline_mode = #tpu.pipeline_mode<synchronous>, transform_indices = @transform_3, window_bounds = array<i64: 1, 10>}, {pipeline_mode = #tpu.pipeline_mode<synchronous>, transform_indices = @transform_4, window_bounds = array<i64: 1, 1>}, {transform_indices = @transform_5, window_bounds = array<i64: 1, 512>}]} {
    %c0 = arith.constant 0 : index
    %c0_0 = arith.constant 0 : index
    %0 = vector.load %arg1[%c0, %c0_0] : memref<10x512xf32, #tpu.memory_space<vmem>>, vector<10x512xf32>
    %c0_1 = arith.constant 0 : index
    %c0_2 = arith.constant 0 : index
    %1 = vector.load %arg2[%c0_1, %c0_2] : memref<10x10xf32, #tpu.memory_space<vmem>>, vector<10x10xf32>
    %cst = arith.constant dense<0.000000e+00> : vector<10x512xf32>
    %2 = tpu.matmul %1, %0, %cst {dimension_numbers = #tpu.dot_dimension_numbers<[1], [0], [0], [1], [0, 0, 1, 1], [], []>} : vector<10x10xf32>, vector<10x512xf32>, vector<10x512xf32> -> vector<10x512xf32>
    %c0_3 = arith.constant 0 : index
    %c0_4 = arith.constant 0 : index
    %3 = vector.load %arg3[%c0_3, %c0_4] : memref<10x1xf32, #tpu.memory_space<vmem>>, vector<10x1xf32>
    %4 = vector.broadcast %3 : vector<10x1xf32> to vector<10x512xf32>
    %5 = arith.addf %2, %4 : vector<10x512xf32>
    %cst_5 = arith.constant 0.000000e+00 : f32
    %6 = vector.broadcast %cst_5 : f32 to vector<10x512xf32>
    %7 = arith.maximumf %5, %6 : vector<10x512xf32>
    %c0_6 = arith.constant 0 : index
    %c0_7 = arith.constant 0 : index
    %8 = vector.load %arg4[%c0_6, %c0_7] : memref<1x10xf32, #tpu.memory_space<vmem>>, vector<1x10xf32>
    %cst_8 = arith.constant dense<0.000000e+00> : vector<1x512xf32>
    %9 = tpu.matmul %8, %7, %cst_8 {dimension_numbers = #tpu.dot_dimension_numbers<[1], [0], [0], [1], [0, 0, 1, 1], [], []>} : vector<1x10xf32>, vector<10x512xf32>, vector<1x512xf32> -> vector<1x512xf32>
    %c0_9 = arith.constant 0 : index
    %c0_10 = arith.constant 0 : index
    %10 = vector.load %arg5[%c0_9, %c0_10] : memref<1x1xf32, #tpu.memory_space<vmem>>, vector<1x1xf32>
    %11 = vector.broadcast %10 : vector<1x1xf32> to vector<1x512xf32>
    %12 = arith.addf %9, %11 : vector<1x512xf32>
    %cst_11 = arith.constant 0.000000e+00 : f32
    %13 = vector.broadcast %cst_11 : f32 to vector<1x512xf32>
    %14 = arith.maximumf %12, %13 : vector<1x512xf32>
    %c0_12 = arith.constant 0 : index
    %c0_13 = arith.constant 0 : index
    %15 = vector.load %arg6[%c0_12, %c0_13] : memref<1x512xf32, #tpu.memory_space<vmem>>, vector<1x512xf32>
    tpu.vector_store %arg6[%c0_12, %c0_13], %14 {strides = array<i32>} : memref<1x512xf32, #tpu.memory_space<vmem>>, vector<1x512xf32>,
    return
  }
  func.func @transform_0(%arg0: i32) -> (i32, i32) {
    %c0_i32 = arith.constant 0 : i32
    %c0_i32_0 = arith.constant 0 : i32
    return %c0_i32, %arg0 : i32, i32
  }
  func.func @transform_1(%arg0: i32) -> (i32, i32) {
    %c0_i32 = arith.constant 0 : i32
    %c0_i32_0 = arith.constant 0 : i32
    %c0_i32_1 = arith.constant 0 : i32
    return %c0_i32, %c0_i32_0 : i32, i32
  }
  func.func @transform_2(%arg0: i32) -> (i32, i32) {
    %c0_i32 = arith.constant 0 : i32
    %c0_i32_0 = arith.constant 0 : i32
    %c0_i32_1 = arith.constant 0 : i32
    return %c0_i32, %c0_i32_0 : i32, i32
  }
  func.func @transform_3(%arg0: i32) -> (i32, i32) {
    %c0_i32 = arith.constant 0 : i32
    %c0_i32_0 = arith.constant 0 : i32
    %c0_i32_1 = arith.constant 0 : i32
    return %c0_i32, %c0_i32_0 : i32, i32
  }
  func.func @transform_4(%arg0: i32) -> (i32, i32) {
    %c0_i32 = arith.constant 0 : i32
    %c0_i32_0 = arith.constant 0 : i32
    %c0_i32_1 = arith.constant 0 : i32
    return %c0_i32, %c0_i32_0 : i32, i32
  }
  func.func @transform_5(%arg0: i32) -> (i32, i32) {
    %c0_i32 = arith.constant 0 : i32
    %c0_i32_0 = arith.constant 0 : i32
    return %c0_i32, %arg0 : i32, i32
  }
}

</mosaic_0001>

<bundles_post_ra>
// kernel: digit_sum_text_rho_1d.1
= control target key start
LH: loop header
LB: loop body
LE: loop exit
PB: predicated region body
PF: predicated region fallthrough
CT: control target
= control target key end

     0   :  { %s631_s0 = inlined_call_operand.vmem [shape: f32[10,512], index: 0, kind: input, shape index: {}]   ;;  %s632_s1 = inlined_call_operand.vmem [shape: f32[10,10], index: 1, kind: input, shape index: {}]   ;;  %s633_s2 = inlined_call_operand.vmem [shape: f32[10,1], index: 2, kind: input, shape index: {}]   ;;  %s634_s3 = inlined_call_operand.vmem [shape: f32[1,10], index: 3, kind: input, shape index: {}]   ;;  %s635_s4 = inlined_call_operand.<no memory space> [shape: f32[1,1], index: 4, kind: input, shape index: {}]   ;;  %s636_s5 = inlined_call_operand.hbm [shape: f32[1,512], index: 5, kind: output, shape index: {}]  }
   0x1   :  { %v10_v0 = vstv %s635_s4 }
   0x2   :  { %11 = vst [vmem:[#allocation2] sm:$0x1] %v10_v0 }
   0x3   :  { %v24_v1 = vld [vmem:[%s631_s0 + $0x8] sm:$0xff]  ;;  %vm52_vm0 = vcmask 1041408   ;;  %v26_v3 = vld [vmem:[%s631_s0 + $0x18] sm:$0xff]  ;;  %vm516_vm1 = vmmov 1   ;;  %v23_v7 = vld [vmem:[%s631_s0] sm:$0xff]  ;;  %v517_v12 = vmov 0.0  }
   0x4   :  { %v28_v2 = vld [vmem:[%s631_s0 + $0x28] sm:$0x3]  ;;  %vm563_vm2 = vmpackc.low %vm52_vm0, %vm516_vm1  ;;  %v30_v6 = vld [vmem:[%s631_s0 + $0x38] sm:$0x3]  ;;  %129 = vmatprep.mubr.f32.mxu0 %v517_v12  ;;  %206 = vmatprep.mubr.f32.mxu1 %v517_v12  ;;  %v518_v15 = vmov 0  }
   0x5   :  { %v461_v4 = vpack.c.bf16 %v28_v2, %v24_v1  ;;  %v467_v8 = vpack.c.bf16 %v30_v6, %v26_v3  ;;  %v27_v9 = vld [vmem:[%s631_s0 + $0x20] sm:$0x3]  ;;  %v25_v10 = vld [vmem:[%s631_s0 + $0x10] sm:$0xff]  ;;  %490 = vset.pattern.permute.xlu0 %v518_v15 }
   0x6   :  { %v29_v11 = vld [vmem:[%s631_s0 + $0x30] sm:$0x3]  ;;  %v464_v13 = vpack.c.bf16 %v27_v9, %v23_v7  ;;  %v33_v16 = vld [vmem:[%s633_s2] sm:$0xff] }
   0x7   :  { %463 = vmatprep.subr.msk.bf16.mxu0 %vm563_vm2, %v461_v4  ;;  %v470_v14 = vpack.c.bf16 %v29_v11, %v25_v10  ;;  %469 = vmatprep.subr.msk.bf16.mxu1 %vm563_vm2, %v467_v8 }
   0x8   :  { %37 = vperm.xlu0 %490, %v33_v16  }
   0x9   :  { %12 = vsyncpa [#allocation4], 0  ;;  %466 = vmatpush1.bf16.msk.msra.mxu0 %vm563_vm2, %v464_v13  ;;  %472 = vmatpush1.bf16.msk.msra.mxu1 %vm563_vm2, %v470_v14  ;;  %v31_v17 = vld [vmem:[%s632_s1] sm:$0xff]  ;;  %vm45_vm3 = vcmask 80896   ;;  %v34_v18 = vld [vmem:[%s633_s2 + $0x8] sm:$0x3]  ;;  %v234_v52 = vlaneseq }
   0xa   :  { %491 = vset.pattern.permute.xlu1 %v518_v15  ;;  %v32_v19 = vld [vmem:[%s632_s1 + $0x8] sm:$0x3]  ;;  %v228_v20 = vld [vmem:[#allocation2] sm:$0x1]  ;;  %v519_v56 = vmov 1966171168  }
   0xb   :  { %231 = vperm.xlu1 %491, %v228_v20   ;;  %v227_v51 = vld [vmem:[%s634_s3] sm:$0x1]  ;;  %v235_v53 = vshrl.u32 %v234_v52, 7  ;;  %v406_v57 = vunpack.c.l.s4 %v519_v56  ;;  %s520_s3 = smov [#allocation3]   ;;  %vm430_vm4 = vcmp.lt.s32.totalorder %v234_v52, 512 }
   0xc   :  { %449 = vmatmul.mubr.msk.f32.vlgmr.msra.gmra.mrb[0].mxu0 %vm45_vm3, %v31_v17  ;;  %453 = vmatmul.mubr.msk.f32.vlgmr.msra.gmra.mrb[0].mxu1 %vm45_vm3, %v31_v17  ;;  %s439_s17 = sshll.u32 %s520_s3, 4  ;;  %s440_s17 = int_to_ptr.vmem [resolvable:$true] %s439_s17 }
   0xd   :  { %135 = vmatprep.mubr.f32.mxu0 %v517_v12  ;;  %212 = vmatprep.mubr.f32.mxu1 %v517_v12  ;;  %v236_v54 = vsub.s32 0, %v235_v53  ;;  %v407_v59 = vunpack.c.0.s8 %v406_v57  ;;  %s492_s18 = scalar_lea.vmem %s440_s17, 64  ;;  %p497_p1 = scmp.lt.s32.totalorder %s440_s17, %s440_s17 }
   0xe   :  { %42 = vperm.xlu0 %490, %v34_v18   ;;  %p493_p0 = scmp.ne.s32.totalorder %s440_s17, %s492_s18  ;;  %p498_p2 = scmp.lt.s32.totalorder %s492_s18, %s492_s18 }
   0xf   :  { %v410_v6 = vsub.s32 %v407_v59, %v235_v53 }
  0x10   :  { %450 = vmatmul.mubr.msk.f32.gmra.mrb[2].mxu0 %vm45_vm3, %v32_v19  ;;  %454 = vmatmul.mubr.msk.f32.gmra.mrb[2].mxu1 %vm45_vm3, %v32_v19  ;;  %p499_p3 = por %p498_p2, %p497_p1 }
  0x11   :  { %317 = vmatprep.mubr.f32.mxu0 %v517_v12  ;;  %388 = vmatprep.mubr.f32.mxu1 %v517_v12 }
  0x12   :  { %p500_p4 = pnand %p499_p3, %p493_p0 }
  0x87   :  { %v38_v21 = vpop.permute.xlu0 %37 }
  0x8a   :  { %v232_v55 = vpop.permute.xlu1 %231 }
  0x8b   :  { %v237_v58 = vrot.slane %v232_v55, %v236_v54 }
  0x8d   :  { %v43_v28 = vpop.permute.xlu0 %42 }
  0xdf   :  { %v131_v22 = vpop.f32.mrb[0].mxu0  ;;  %v208_v23 = vpop.f32.mrb[0].mxu1 }
  0xe0   :  { %v133_v24 = vpop.f32.mrb[1].mxu0  ;;  %v210_v25 = vpop.f32.mrb[1].mxu1  ;;  %v132_v26 = vadd.f32 %v131_v22, %v38_v21  ;;  %v209_v27 = vadd.f32 %v208_v23, %v38_v21 }
  0xe1   :  { %v134_v29 = vadd.f32 %v133_v24, %v38_v21  ;;  %v211_v30 = vadd.f32 %v210_v25, %v38_v21 }
  0xe2   :  { %v219_v39 = vmax.f32 %v132_v26, 0.0  ;;  %v221_v40 = vmax.f32 %v209_v27, 0.0 }
  0xe3   :  { %v137_v31 = vpop.f32.mrb[2].mxu0  ;;  %v214_v32 = vpop.f32.mrb[2].mxu1  ;;  %v220_v43 = vmax.f32 %v134_v29, 0.0  ;;  %v222_v44 = vmax.f32 %v211_v30, 0.0 }
  0xe4   :  { %v138_v33 = vadd.f32 %v137_v31, %v43_v28  ;;  %v215_v34 = vadd.f32 %v214_v32, %v43_v28  ;;  %v139_v35 = vpop.f32.mrb[3].mxu0  ;;  %v216_v36 = vpop.f32.mrb[3].mxu1 }
  0xe5   :  { %v140_v37 = vadd.f32 %v139_v35, %v43_v28  ;;  %v217_v38 = vadd.f32 %v216_v36, %v43_v28 }
  0xe6   :  { %v223_v41 = vmax.f32 %v138_v33, 0.0  ;;  %v225_v42 = vmax.f32 %v215_v34, 0.0 }
  0xe7   :  { %v224_v45 = vmax.f32 %v140_v37, 0.0  ;;  %v226_v46 = vmax.f32 %v217_v38, 0.0 }
  0xe8   :  { %v476_v47 = vpack.c.bf16 %v223_v41, %v219_v39  ;;  %v482_v48 = vpack.c.bf16 %v225_v42, %v221_v40 }
  0xe9   :  { %v473_v49 = vpack.c.bf16 %v224_v45, %v220_v43  ;;  %v479_v50 = vpack.c.bf16 %v226_v46, %v222_v44 }
  0xeb   :  { %475 = vmatprep.subr.msk.bf16.mxu0 %vm563_vm2, %v473_v49  ;;  %481 = vmatprep.subr.msk.bf16.mxu1 %vm563_vm2, %v479_v50 }
  0xec   :  { %478 = vmatpush1.bf16.msk.msra.mxu0 %vm563_vm2, %v476_v47  ;;  %484 = vmatpush1.bf16.msk.msra.mxu1 %vm563_vm2, %v482_v48 }
  0xef   :  { %457 = vmatmul.mubr.msk.f32.vlgmr.msra.gmra.mrb[4].mxu0 %vm45_vm3, %v227_v51  ;;  %460 = vmatmul.mubr.msk.f32.vlgmr.msra.gmra.mrb[4].mxu1 %vm45_vm3, %v227_v51 }
 0x1c2   :  { %v319_v60 = vpop.f32.mrb[4].mxu0  ;;  %v390_v61 = vpop.f32.mrb[4].mxu1 }
 0x1c3   :  { %v320_v62 = vadd.f32 %v319_v60, %v237_v58  ;;  %v391_v63 = vadd.f32 %v390_v61, %v237_v58  ;;  %v321_v0 = vpop.f32.mrb[5].mxu0  ;;  %v392_v1 = vpop.f32.mrb[5].mxu1 }
 0x1c4   :  { %v322_v2 = vadd.f32 %v321_v0, %v237_v58  ;;  %v393_v3 = vadd.f32 %v392_v1, %v237_v58 }
 0x1c5   :  { %v395_v4 = vmax.f32 %v320_v62, 0.0  ;;  %v397_v5 = vmax.f32 %v391_v63, 0.0 }
 0x1c6   :  { %v396_v7 = vmax.f32 %v322_v2, 0.0  ;;  %v398_v8 = vmax.f32 %v393_v3, 0.0 }
 0x1c8   :  { %v403_v9 = vcombine.low %v395_v4, %v396_v7  ;;  %v404_v10 = vcombine.low %v397_v5, %v398_v8 }
 0x1ca   :  { %v411_v11 = vrot.slane %v403_v9, %v410_v6  ;;  %v418_v12 = vrot.slane %v404_v10, %v410_v6 }
 0x1cc   :  { %v419_v13 = vcombine.low %v411_v11, %v418_v12 }
 0x1ce   :  { %v426_v14 = vrot.slane %v419_v13, %v410_v6 }
 0x1d0   :  { %432 = vst.msk [vmem:[#allocation3] sm:$0xf] %vm430_vm4, %v426_v14 }
 0x1d1   :  { %503 = shalt.err (!%p500_p4)
}
 0x1d2   :  { %s504_s21 = scalar_lea.hbm %s636_s5, 64 }
 0x1d3   :  { %p505_p5 = scmp.ne.s32.totalorder %s636_s5, %s504_s21  ;;  %p508_p6 = scmp.lt.u32.totalorder %s504_s21, %s636_s5 }
 0x1d5   :  { %p510_p7 = pnand %p508_p6, %p505_p5 }
 0x1d7   :  { %513 = shalt.err (!%p510_p7)
}
 0x1d8   :  { %442 = dma.vmem_to_hbm [thread:$0]  %s440_s17, 64, %s636_s5, [#allocation4]  }
 0x1d9   :  { %514 = dma.done.wait [#allocation4], 64  }
 0x1da   :  { %515 = vsyncadd [#allocation4], 4294967232 }
 0x1db   :  { %446 = vsyncpa [#allocation4], 1 }

</bundles_post_ra>
